<compile_context>
chip_gen: v7x
topology: tpu7x:2x2x1
jax: 0.10.0
libtpu: 0.0.40
codegen_flags: <defaults>
</compile_context>

<pallas_src>
from functools import partial

import numpy as np
import jax
import jax.numpy as jnp
from jax.experimental import pallas as pl
from jax.experimental.pallas import tpu as pltpu


def sobel_kernels(window_size=3):
    """Same construction as the PyTorch `sobel()` helper (F.conv2d is
    cross-correlation, so no kernel flip)."""
    assert window_size % 2 != 0
    ind = window_size // 2
    matx = np.zeros((window_size, window_size), np.float32)
    maty = np.zeros((window_size, window_size), np.float32)
    for jj, j in enumerate(range(-ind, ind + 1)):
        for ii, i in enumerate(range(-ind, ind + 1)):
            denom = float(i * i + j * j)
            matx[jj, ii] = 0.0 if denom == 0.0 else i / denom
            maty[jj, ii] = 0.0 if denom == 0.0 else j / denom
    mult = {3: 2.0, 5: 20.0, 7: 780.0}[window_size]
    return matx * mult, maty * mult


def _banded_matrices(H, W):
    """Banded matrices implementing the separable 3x3 Sobel with zero padding.

      (x @ diff_w)[y, xo]   = x[y, xo+1] - x[y, xo-1]
      (x @ smooth_w)[y, xo] = x[y, xo-1] + 2 x[y, xo] + x[y, xo+1]
      (diff_h @ x)[yo, x]   = x[yo+1, x] - x[yo-1, x]
      (smooth_h @ x)[yo, x] = x[yo-1, x] + 2 x[yo, x] + x[yo+1, x]
    """
    def band(n, lower, diag, upper):
        m = np.zeros((n, n), np.float32)
        idx = np.arange(n)
        m[idx, idx] = diag
        m[idx[1:], idx[:-1]] = lower      # m[c+1, c]
        m[idx[:-1], idx[1:]] = upper      # m[c-1, c] (one above diag)
        return m

    diff_w = band(W, lower=1.0, diag=0.0, upper=-1.0)     # m[xo+1,xo]=1, m[xo-1,xo]=-1
    smooth_w = band(W, lower=1.0, diag=2.0, upper=1.0)
    diff_h = band(H, lower=-1.0, diag=0.0, upper=1.0)      # m[yo,yo+1]=1, m[yo,yo-1]=-1
    smooth_h = band(H, lower=1.0, diag=2.0, upper=1.0)
    return diff_w, smooth_w, diff_h, smooth_h


def _gradloss_kernel(pred_ref, label_ref, dw_ref, sw_ref, dh_ref, sh_ref,
                     out_ref, *, tc):
    # (1, tc, H, W) unpadded tiles; upcast in-kernel (cheap VPU op).
    d = pred_ref[0].astype(jnp.float32) - label_ref[0].astype(jnp.float32)  # (tc,H,W)

    diff_w = dw_ref[...]
    smooth_w = sw_ref[...]
    diff_h = dh_ref[...]
    smooth_h = sh_ref[...]

    # Separable Sobel on the MXU:
    #   gx = smooth_h @ (d @ diff_w),   gy = (diff_h @ d) @ smooth_w
    acc = jnp.float32(0.0)
    for c in range(tc):  # static unroll, tc <= 8
        dc = d[c]  # (H, W)
        gx = jnp.dot(smooth_h,
                     jnp.dot(dc, diff_w, preferred_element_type=jnp.float32),
                     preferred_element_type=jnp.float32)
        gy = jnp.dot(jnp.dot(diff_h, dc, preferred_element_type=jnp.float32),
                     smooth_w, preferred_element_type=jnp.float32)
        acc = acc + jnp.sum(jnp.abs(gx)) + jnp.sum(jnp.abs(gy))

    # Per-block partial sum, written as one lane-dense (8,128) f32 tile.
    out_ref[...] = jnp.full(out_ref.shape, acc, jnp.float32)


def _pick_channel_tile(C, H, W, max_unroll=8, max_block_bytes=1 << 20):
    """Largest channel tile (<= max_unroll, divides C) keeping blocks ~<= 1 MiB."""
    for cand in range(min(C, max_unroll), 0, -1):
        if C % cand == 0 and cand * H * W * 4 <= max_block_bytes:
            return cand
    return 1


def grad_loss(pred, label, window_size=3, padding=1):
    assert pred.shape == label.shape and pred.ndim == 4
    # TODO(synk): only the separable window_size=3, padding=1 configuration
    # (the PyTorch module's default) is implemented as a fused kernel.
    assert window_size == 3 and padding == 1

    B, C, H, W = pred.shape
    tc = _pick_channel_tile(C, H, W)
    n_ct = C // tc
    n_total = float(B * C * H * W)

    diff_w, smooth_w, diff_h, smooth_h = _banded_matrices(H, W)
    diff_w = jnp.asarray(diff_w)
    smooth_w = jnp.asarray(smooth_w)
    diff_h = jnp.asarray(diff_h)
    smooth_h = jnp.asarray(smooth_h)

    kernel = partial(_gradloss_kernel, tc=tc)

    elt = jnp.dtype(pred.dtype).itemsize
    block_bytes = tc * H * W * elt
    mats_bytes = 2 * (H * H + W * W) * 4
    vmem_limit = int(min(64 * 1024 * 1024,
                         max(16 * 1024 * 1024,
                             4 * block_bytes + 2 * mats_bytes + (2 << 20))))

    const_spec_w = pl.BlockSpec((W, W), lambda b, c: (0, 0))
    const_spec_h = pl.BlockSpec((H, H), lambda b, c: (0, 0))

    partials = pl.pallas_call(
        kernel,
        out_shape=jax.ShapeDtypeStruct((B, n_ct, 8, 128), jnp.float32),
        grid_spec=pltpu.PrefetchScalarGridSpec(
            num_scalar_prefetch=0,
            grid=(B, n_ct),
            in_specs=[
                pl.BlockSpec((1, tc, H, W), lambda b, c: (b, c, 0, 0)),
                pl.BlockSpec((1, tc, H, W), lambda b, c: (b, c, 0, 0)),
                const_spec_w,   # diff_w
                const_spec_w,   # smooth_w
                const_spec_h,   # diff_h
                const_spec_h,   # smooth_h
            ],
            out_specs=pl.BlockSpec((1, 1, 8, 128), lambda b, c: (b, c, 0, 0)),
        ),
        compiler_params=pltpu.CompilerParams(
            dimension_semantics=("parallel", "parallel"),
            vmem_limit_bytes=vmem_limit),
    )(pred, label, diff_w, smooth_w, diff_h, smooth_h)

    # Every lane of a partial tile holds the same value; take one per block.
    return partials[:, :, 0, 0].sum() / n_total


def _grad_loss_ref(pred, label, window_size=3, padding=1):
    """Pure-JAX reference (same math as the PyTorch module)."""
    kx, ky = sobel_kernels(window_size)
    pad_cfg = ((0, 0), (0, 0), (padding, padding), (padding, padding))

    def conv(img, k):
        imgp = jnp.pad(img.astype(jnp.float32), pad_cfg)
        B, C, Hp, Wp = imgp.shape
        Ho, Wo = Hp - window_size + 1, Wp - window_size + 1
        out = jnp.zeros((B, C, Ho, Wo), jnp.float32)
        for j in range(window_size):
            for i in range(window_size):
                out = out + float(k[j, i]) * imgp[:, :, j:j + Ho, i:i + Wo]
        return out

    gxd = jnp.abs(conv(pred, kx) - conv(label, kx))
    gyd = jnp.abs(conv(pred, ky) - conv(label, ky))
    return jnp.mean(gxd) + jnp.mean(gyd)


if __name__ == "__main__":
    key = jax.random.PRNGKey(0)
    k1, k2 = jax.random.split(key)
    B, C, H, W = 2, 4, 16, 16
    pred = jax.random.normal(k1, (B, C, H, W), dtype=jnp.float32)
    label = jax.random.normal(k2, (B, C, H, W), dtype=jnp.float32)

    loss = jax.block_until_ready(grad_loss(pred, label))
    ref = jax.block_until_ready(_grad_loss_ref(pred, label))

    np.testing.assert_allclose(np.asarray(loss), np.asarray(ref),
                               rtol=1e-3, atol=1e-3)
    print("KERNEL_OK")
</pallas_src>

<mosaic_0001>
module attributes {stable_mosaic.version = 11 : i64} {
  func.func @_gradloss_kernel(%arg0: i32, %arg1: i32, %arg2: memref<1x4x16x16xf32, #tpu.memory_space<vmem>>, %arg3: memref<1x4x16x16xf32, #tpu.memory_space<vmem>>, %arg4: memref<16x16xf32, #tpu.memory_space<vmem>>, %arg5: memref<16x16xf32, #tpu.memory_space<vmem>>, %arg6: memref<16x16xf32, #tpu.memory_space<vmem>>, %arg7: memref<16x16xf32, #tpu.memory_space<vmem>>, %arg8: memref<1x1x8x128xf32, #tpu.memory_space<vmem>>) attributes {dimension_semantics = [#tpu.dimension_semantics<parallel>, #tpu.dimension_semantics<parallel>], iteration_bounds = array<i64: 2, 1>, scalar_prefetch = 0 : i64, scratch_operands = 0 : i64, tpu.core_type = #tpu.core_type<tc>, window_params = [{transform_indices = @transform_0, window_bounds = array<i64: 1, 4, 16, 16>}, {transform_indices = @transform_1, window_bounds = array<i64: 1, 4, 16, 16>}, {pipeline_mode = #tpu.pipeline_mode<synchronous>, transform_indices = @transform_2, window_bounds = array<i64: 16, 16>}, {pipeline_mode = #tpu.pipeline_mode<synchronous>, transform_indices = @transform_3, window_bounds = array<i64: 16, 16>}, {pipeline_mode = #tpu.pipeline_mode<synchronous>, transform_indices = @transform_4, window_bounds = array<i64: 16, 16>}, {pipeline_mode = #tpu.pipeline_mode<synchronous>, transform_indices = @transform_5, window_bounds = array<i64: 16, 16>}, {transform_indices = @transform_6, window_bounds = array<i64: 1, 1, 8, 128>}]} {
    %c0 = arith.constant 0 : index
    %c0_0 = arith.constant 0 : index
    %c0_1 = arith.constant 0 : index
    %c0_2 = arith.constant 0 : index
    %0 = vector.load %arg2[%c0, %c0_0, %c0_1, %c0_2] : memref<1x4x16x16xf32, #tpu.memory_space<vmem>>, vector<1x4x16x16xf32>
    %1 = vector.shape_cast %0 : vector<1x4x16x16xf32> to vector<4x16x16xf32>
    %c0_3 = arith.constant 0 : index
    %c0_4 = arith.constant 0 : index
    %c0_5 = arith.constant 0 : index
    %c0_6 = arith.constant 0 : index
    %2 = vector.load %arg3[%c0_3, %c0_4, %c0_5, %c0_6] : memref<1x4x16x16xf32, #tpu.memory_space<vmem>>, vector<1x4x16x16xf32>
    %3 = vector.shape_cast %2 : vector<1x4x16x16xf32> to vector<4x16x16xf32>
    %4 = arith.subf %1, %3 : vector<4x16x16xf32>
    %c0_7 = arith.constant 0 : index
    %c0_8 = arith.constant 0 : index
    %5 = vector.load %arg4[%c0_7, %c0_8] : memref<16x16xf32, #tpu.memory_space<vmem>>, vector<16x16xf32>
    %c0_9 = arith.constant 0 : index
    %c0_10 = arith.constant 0 : index
    %6 = vector.load %arg5[%c0_9, %c0_10] : memref<16x16xf32, #tpu.memory_space<vmem>>, vector<16x16xf32>
    %c0_11 = arith.constant 0 : index
    %c0_12 = arith.constant 0 : index
    %7 = vector.load %arg6[%c0_11, %c0_12] : memref<16x16xf32, #tpu.memory_space<vmem>>, vector<16x16xf32>
    %c0_13 = arith.constant 0 : index
    %c0_14 = arith.constant 0 : index
    %8 = vector.load %arg7[%c0_13, %c0_14] : memref<16x16xf32, #tpu.memory_space<vmem>>, vector<16x16xf32>
    %9 = vector.extract_strided_slice %4 {offsets = [0, 0, 0], sizes = [1, 16, 16], strides = [1, 1, 1]} : vector<4x16x16xf32> to vector<1x16x16xf32>
    %10 = vector.shape_cast %9 : vector<1x16x16xf32> to vector<16x16xf32>
    %cst = arith.constant dense<0.000000e+00> : vector<16x16xf32>
    %11 = tpu.matmul %10, %5, %cst {dimension_numbers = #tpu.dot_dimension_numbers<[1], [0], [0], [1], [0, 0, 1, 1], [], []>} : vector<16x16xf32>, vector<16x16xf32>, vector<16x16xf32> -> vector<16x16xf32>
    %cst_15 = arith.constant dense<0.000000e+00> : vector<16x16xf32>
    %12 = tpu.matmul %8, %11, %cst_15 {dimension_numbers = #tpu.dot_dimension_numbers<[1], [0], [0], [1], [0, 0, 1, 1], [], []>} : vector<16x16xf32>, vector<16x16xf32>, vector<16x16xf32> -> vector<16x16xf32>
    %cst_16 = arith.constant dense<0.000000e+00> : vector<16x16xf32>
    %13 = tpu.matmul %7, %10, %cst_16 {dimension_numbers = #tpu.dot_dimension_numbers<[1], [0], [0], [1], [0, 0, 1, 1], [], []>} : vector<16x16xf32>, vector<16x16xf32>, vector<16x16xf32> -> vector<16x16xf32>
    %cst_17 = arith.constant dense<0.000000e+00> : vector<16x16xf32>
    %14 = tpu.matmul %13, %6, %cst_17 {dimension_numbers = #tpu.dot_dimension_numbers<[1], [0], [0], [1], [0, 0, 1, 1], [], []>} : vector<16x16xf32>, vector<16x16xf32>, vector<16x16xf32> -> vector<16x16xf32>
    %15 = math.absf %12 : vector<16x16xf32>
    %16 = vector.shape_cast %15 : vector<16x16xf32> to vector<1x16x16xf32>
    %cst_18 = arith.constant dense<0.000000e+00> : vector<1xf32>
    %17 = vector.multi_reduction <add>, %16, %cst_18 [1, 2] : vector<1x16x16xf32> to vector<1xf32>
    %18 = vector.shape_cast %17 : vector<1xf32> to vector<1x1x1xf32>
    %19 = vector.extract %18[0, 0, 0] : f32 from vector<1x1x1xf32>
    %cst_19 = arith.constant 0.000000e+00 : f32
    %20 = arith.addf %cst_19, %19 : f32
    %21 = math.absf %14 : vector<16x16xf32>
    %22 = vector.shape_cast %21 : vector<16x16xf32> to vector<1x16x16xf32>
    %cst_20 = arith.constant dense<0.000000e+00> : vector<1xf32>
    %23 = vector.multi_reduction <add>, %22, %cst_20 [1, 2] : vector<1x16x16xf32> to vector<1xf32>
    %24 = vector.shape_cast %23 : vector<1xf32> to vector<1x1x1xf32>
    %25 = vector.extract %24[0, 0, 0] : f32 from vector<1x1x1xf32>
    %26 = arith.addf %20, %25 : f32
    %27 = vector.extract_strided_slice %4 {offsets = [1, 0, 0], sizes = [1, 16, 16], strides = [1, 1, 1]} : vector<4x16x16xf32> to vector<1x16x16xf32>
    %28 = vector.shape_cast %27 : vector<1x16x16xf32> to vector<16x16xf32>
    %cst_21 = arith.constant dense<0.000000e+00> : vector<16x16xf32>
    %29 = tpu.matmul %28, %5, %cst_21 {dimension_numbers = #tpu.dot_dimension_numbers<[1], [0], [0], [1], [0, 0, 1, 1], [], []>} : vector<16x16xf32>, vector<16x16xf32>, vector<16x16xf32> -> vector<16x16xf32>
    %cst_22 = arith.constant dense<0.000000e+00> : vector<16x16xf32>
    %30 = tpu.matmul %8, %29, %cst_22 {dimension_numbers = #tpu.dot_dimension_numbers<[1], [0], [0], [1], [0, 0, 1, 1], [], []>} : vector<16x16xf32>, vector<16x16xf32>, vector<16x16xf32> -> vector<16x16xf32>
    %cst_23 = arith.constant dense<0.000000e+00> : vector<16x16xf32>
    %31 = tpu.matmul %7, %28, %cst_23 {dimension_numbers = #tpu.dot_dimension_numbers<[1], [0], [0], [1], [0, 0, 1, 1], [], []>} : vector<16x16xf32>, vector<16x16xf32>, vector<16x16xf32> -> vector<16x16xf32>
    %cst_24 = arith.constant dense<0.000000e+00> : vector<16x16xf32>
    %32 = tpu.matmul %31, %6, %cst_24 {dimension_numbers = #tpu.dot_dimension_numbers<[1], [0], [0], [1], [0, 0, 1, 1], [], []>} : vector<16x16xf32>, vector<16x16xf32>, vector<16x16xf32> -> vector<16x16xf32>
    %33 = math.absf %30 : vector<16x16xf32>
    %34 = vector.shape_cast %33 : vector<16x16xf32> to vector<1x16x16xf32>
    %cst_25 = arith.constant dense<0.000000e+00> : vector<1xf32>
    %35 = vector.multi_reduction <add>, %34, %cst_25 [1, 2] : vector<1x16x16xf32> to vector<1xf32>
    %36 = vector.shape_cast %35 : vector<1xf32> to vector<1x1x1xf32>
    %37 = vector.extract %36[0, 0, 0] : f32 from vector<1x1x1xf32>
    %38 = arith.addf %26, %37 : f32
    %39 = math.absf %32 : vector<16x16xf32>
    %40 = vector.shape_cast %39 : vector<16x16xf32> to vector<1x16x16xf32>
    %cst_26 = arith.constant dense<0.000000e+00> : vector<1xf32>
    %41 = vector.multi_reduction <add>, %40, %cst_26 [1, 2] : vector<1x16x16xf32> to vector<1xf32>
    %42 = vector.shape_cast %41 : vector<1xf32> to vector<1x1x1xf32>
    %43 = vector.extract %42[0, 0, 0] : f32 from vector<1x1x1xf32>
    %44 = arith.addf %38, %43 : f32
    %45 = vector.extract_strided_slice %4 {offsets = [2, 0, 0], sizes = [1, 16, 16], strides = [1, 1, 1]} : vector<4x16x16xf32> to vector<1x16x16xf32>
    %46 = vector.shape_cast %45 : vector<1x16x16xf32> to vector<16x16xf32>
    %cst_27 = arith.constant dense<0.000000e+00> : vector<16x16xf32>
    %47 = tpu.matmul %46, %5, %cst_27 {dimension_numbers = #tpu.dot_dimension_numbers<[1], [0], [0], [1], [0, 0, 1, 1], [], []>} : vector<16x16xf32>, vector<16x16xf32>, vector<16x16xf32> -> vector<16x16xf32>
    %cst_28 = arith.constant dense<0.000000e+00> : vector<16x16xf32>
    %48 = tpu.matmul %8, %47, %cst_28 {dimension_numbers = #tpu.dot_dimension_numbers<[1], [0], [0], [1], [0, 0, 1, 1], [], []>} : vector<16x16xf32>, vector<16x16xf32>, vector<16x16xf32> -> vector<16x16xf32>
    %cst_29 = arith.constant dense<0.000000e+00> : vector<16x16xf32>
    %49 = tpu.matmul %7, %46, %cst_29 {dimension_numbers = #tpu.dot_dimension_numbers<[1], [0], [0], [1], [0, 0, 1, 1], [], []>} : vector<16x16xf32>, vector<16x16xf32>, vector<16x16xf32> -> vector<16x16xf32>
    %cst_30 = arith.constant dense<0.000000e+00> : vector<16x16xf32>
    %50 = tpu.matmul %49, %6, %cst_30 {dimension_numbers = #tpu.dot_dimension_numbers<[1], [0], [0], [1], [0, 0, 1, 1], [], []>} : vector<16x16xf32>, vector<16x16xf32>, vector<16x16xf32> -> vector<16x16xf32>
    %51 = math.absf %48 : vector<16x16xf32>
    %52 = vector.shape_cast %51 : vector<16x16xf32> to vector<1x16x16xf32>
    %cst_31 = arith.constant dense<0.000000e+00> : vector<1xf32>
    %53 = vector.multi_reduction <add>, %52, %cst_31 [1, 2] : vector<1x16x16xf32> to vector<1xf32>
    %54 = vector.shape_cast %53 : vector<1xf32> to vector<1x1x1xf32>
    %55 = vector.extract %54[0, 0, 0] : f32 from vector<1x1x1xf32>
    %56 = arith.addf %44, %55 : f32
    %57 = math.absf %50 : vector<16x16xf32>
    %58 = vector.shape_cast %57 : vector<16x16xf32> to vector<1x16x16xf32>
    %cst_32 = arith.constant dense<0.000000e+00> : vector<1xf32>
    %59 = vector.multi_reduction <add>, %58, %cst_32 [1, 2] : vector<1x16x16xf32> to vector<1xf32>
    %60 = vector.shape_cast %59 : vector<1xf32> to vector<1x1x1xf32>
    %61 = vector.extract %60[0, 0, 0] : f32 from vector<1x1x1xf32>
    %62 = arith.addf %56, %61 : f32
    %63 = vector.extract_strided_slice %4 {offsets = [3, 0, 0], sizes = [1, 16, 16], strides = [1, 1, 1]} : vector<4x16x16xf32> to vector<1x16x16xf32>
    %64 = vector.shape_cast %63 : vector<1x16x16xf32> to vector<16x16xf32>
    %cst_33 = arith.constant dense<0.000000e+00> : vector<16x16xf32>
    %65 = tpu.matmul %64, %5, %cst_33 {dimension_numbers = #tpu.dot_dimension_numbers<[1], [0], [0], [1], [0, 0, 1, 1], [], []>} : vector<16x16xf32>, vector<16x16xf32>, vector<16x16xf32> -> vector<16x16xf32>
    %cst_34 = arith.constant dense<0.000000e+00> : vector<16x16xf32>
    %66 = tpu.matmul %8, %65, %cst_34 {dimension_numbers = #tpu.dot_dimension_numbers<[1], [0], [0], [1], [0, 0, 1, 1], [], []>} : vector<16x16xf32>, vector<16x16xf32>, vector<16x16xf32> -> vector<16x16xf32>
    %cst_35 = arith.constant dense<0.000000e+00> : vector<16x16xf32>
    %67 = tpu.matmul %7, %64, %cst_35 {dimension_numbers = #tpu.dot_dimension_numbers<[1], [0], [0], [1], [0, 0, 1, 1], [], []>} : vector<16x16xf32>, vector<16x16xf32>, vector<16x16xf32> -> vector<16x16xf32>
    %cst_36 = arith.constant dense<0.000000e+00> : vector<16x16xf32>
    %68 = tpu.matmul %67, %6, %cst_36 {dimension_numbers = #tpu.dot_dimension_numbers<[1], [0], [0], [1], [0, 0, 1, 1], [], []>} : vector<16x16xf32>, vector<16x16xf32>, vector<16x16xf32> -> vector<16x16xf32>
    %69 = math.absf %66 : vector<16x16xf32>
    %70 = vector.shape_cast %69 : vector<16x16xf32> to vector<1x16x16xf32>
    %cst_37 = arith.constant dense<0.000000e+00> : vector<1xf32>
    %71 = vector.multi_reduction <add>, %70, %cst_37 [1, 2] : vector<1x16x16xf32> to vector<1xf32>
    %72 = vector.shape_cast %71 : vector<1xf32> to vector<1x1x1xf32>
    %73 = vector.extract %72[0, 0, 0] : f32 from vector<1x1x1xf32>
    %74 = arith.addf %62, %73 : f32
    %75 = math.absf %68 : vector<16x16xf32>
    %76 = vector.shape_cast %75 : vector<16x16xf32> to vector<1x16x16xf32>
    %cst_38 = arith.constant dense<0.000000e+00> : vector<1xf32>
    %77 = vector.multi_reduction <add>, %76, %cst_38 [1, 2] : vector<1x16x16xf32> to vector<1xf32>
    %78 = vector.shape_cast %77 : vector<1xf32> to vector<1x1x1xf32>
    %79 = vector.extract %78[0, 0, 0] : f32 from vector<1x1x1xf32>
    %80 = arith.addf %74, %79 : f32
    %81 = vector.broadcast %80 : f32 to vector<1x1x8x128xf32>
    %c0_39 = arith.constant 0 : index
    %c0_40 = arith.constant 0 : index
    %c0_41 = arith.constant 0 : index
    %c0_42 = arith.constant 0 : index
    %82 = vector.load %arg8[%c0_39, %c0_40, %c0_41, %c0_42] : memref<1x1x8x128xf32, #tpu.memory_space<vmem>>, vector<1x1x8x128xf32>
    tpu.vector_store %arg8[%c0_39, %c0_40, %c0_41, %c0_42], %81 {strides = array<i32>} : memref<1x1x8x128xf32, #tpu.memory_space<vmem>>, vector<1x1x8x128xf32>,
    return
  }
  func.func @transform_0(%arg0: i32, %arg1: i32) -> (i32, i32, i32, i32) {
    %c0_i32 = arith.constant 0 : i32
    %c0_i32_0 = arith.constant 0 : i32
    %c0_i32_1 = arith.constant 0 : i32
    return %arg0, %arg1, %c0_i32, %c0_i32_0 : i32, i32, i32, i32
  }
  func.func @transform_1(%arg0: i32, %arg1: i32) -> (i32, i32, i32, i32) {
    %c0_i32 = arith.constant 0 : i32
    %c0_i32_0 = arith.constant 0 : i32
    %c0_i32_1 = arith.constant 0 : i32
    return %arg0, %arg1, %c0_i32, %c0_i32_0 : i32, i32, i32, i32
  }
  func.func @transform_2(%arg0: i32, %arg1: i32) -> (i32, i32) {
    %c0_i32 = arith.constant 0 : i32
    %c0_i32_0 = arith.constant 0 : i32
    %c0_i32_1 = arith.constant 0 : i32
    return %c0_i32, %c0_i32_0 : i32, i32
  }
  func.func @transform_3(%arg0: i32, %arg1: i32) -> (i32, i32) {
    %c0_i32 = arith.constant 0 : i32
    %c0_i32_0 = arith.constant 0 : i32
    %c0_i32_1 = arith.constant 0 : i32
    return %c0_i32, %c0_i32_0 : i32, i32
  }
  func.func @transform_4(%arg0: i32, %arg1: i32) -> (i32, i32) {
    %c0_i32 = arith.constant 0 : i32
    %c0_i32_0 = arith.constant 0 : i32
    %c0_i32_1 = arith.constant 0 : i32
    return %c0_i32, %c0_i32_0 : i32, i32
  }
  func.func @transform_5(%arg0: i32, %arg1: i32) -> (i32, i32) {
    %c0_i32 = arith.constant 0 : i32
    %c0_i32_0 = arith.constant 0 : i32
    %c0_i32_1 = arith.constant 0 : i32
    return %c0_i32, %c0_i32_0 : i32, i32
  }
  func.func @transform_6(%arg0: i32, %arg1: i32) -> (i32, i32, i32, i32) {
    %c0_i32 = arith.constant 0 : i32
    %c0_i32_0 = arith.constant 0 : i32
    %c0_i32_1 = arith.constant 0 : i32
    return %arg0, %arg1, %c0_i32, %c0_i32_0 : i32, i32, i32, i32
  }
}

</mosaic_0001>

<bundles_post_ra>
// kernel: tpu_custom_call.1
= control target key start
LH: loop header
LB: loop body
LE: loop exit
PB: predicated region body
PF: predicated region fallthrough
CT: control target
= control target key end

     0   :  { %s3048_s0 = inlined_call_operand.hbm [shape: f32[2,4,16,16], index: 0, kind: input, shape index: {}]   ;;  %s3049_s1 = inlined_call_operand.hbm [shape: f32[2,4,16,16], index: 1, kind: input, shape index: {}]   ;;  %s3050_s2 = inlined_call_operand.hbm [shape: f32[16,16], index: 2, kind: input, shape index: {}]   ;;  %s3051_s3 = inlined_call_operand.hbm [shape: f32[16,16], index: 3, kind: input, shape index: {}]   ;;  %s3052_s4 = inlined_call_operand.hbm [shape: f32[16,16], index: 4, kind: input, shape index: {}]   ;;  %s3053_s5 = inlined_call_operand.vmem [shape: f32[16,16], index: 5, kind: input, shape index: {}]   ;;  %s3054_s6 = inlined_call_operand.hbm [shape: f32[2,1,8,128], index: 6, kind: output, shape index: {}]  }
   0x1   :  { %3064 = sst [smem:[#allocation19_spill]] %s3048_s0 }
   0x2   :  { %3065 = sst [smem:[#allocation20_spill]] %s3049_s1 }
   0x3   :  { %3066 = sst [smem:[#allocation21_spill]] %s3050_s2 }
   0x4   :  { %3067 = sst [smem:[#allocation22_spill]] %s3051_s3 }
   0x5   :  { %3068 = sst [smem:[#allocation23_spill]] %s3052_s4 }
   0x6   :  { %3069 = sst [smem:[#allocation24_spill]] %s3053_s5 }
   0x7   :  { %11 = vsyncpa [#allocation3], 0 }
   0x8   :  { %13 = vsyncpa [#allocation3 + $0x1], 0 }
   0x9   :  { %14 = vsyncpa [#allocation6], 0 }
   0xa   :  { %16 = vsyncpa [#allocation6 + $0x1], 0 }
   0xb   :  { %17 = vsyncpa [#allocation9], 0 }
   0xc   :  { %18 = vsyncpa [#allocation4], 0 }
   0xd   :  { %20 = vsyncpa [#allocation4 + $0x1], 0  ;;  %s2642_s21 = smov 0   ;;  %s2644_s22 = smov 0  }
   0xe   :  { %s2646_s23 = smov 0   ;;  %s2648_s24 = smov 0  }
   0xf   :  { %s2650_s25 = smov 0   ;;  %s2652_s26 = smov 0  }
  0x10 LB: > { %3070 = sst [smem:[#allocation17_spill]] %s2577_s21  ;;  %s2673_s27 = sadd.s32 4294967295, %s2597_s26   ;;  %s2597_s26 = sphi %s2652_s26, %s26_s26   ;;  %s2593_s25 = sphi %s2650_s25, %s3102_s25   ;;  %s2589_s24 = sphi %s2648_s24, %s3101_s24   ;;  %s2585_s23 = sphi %s2646_s23, %s3100_s23   ;;  %s2581_s22 = sphi %s2644_s22, %s3099_s22   ;;  %s2577_s21 = sphi %s2642_s21, %s3098_s21  }
  0x11   : > { %s1946_s28 = sadd.s32 4294967294, %s2597_s26   ;;  %p60_p0 = scmp.ne.s32.totalorder %s2581_s22, %s2577_s21 }
  0x12   : > { %p3055_p1 = scmp.eq.s32.totalorder %s2673_s27, 0  ;;  %p204_p3 = scmp.eq.s32.totalorder %s1946_s28, 1 }
  0x13   : > { %p1947_p5 = scmp.ge.s32.totalorder %s2597_s26, 1  ;;  %p211_p7 = scmp.lt.s32.totalorder %s2597_s26, 3 }
  0x14   : > { %p2682_p4 = por %p3055_p1, %p60_p0  ;;  %p2687_p6 = por %p204_p3, %p60_p0 }
  0x15   : > { %p2692_p8 = pnand %p1947_p5, %p211_p7  ;;  %s2599_s8 = smov [#allocation7]  }
  0x16   : > { %s3071_s29 = scalar_select %p2682_p4, 1, 0 }
  0x17   : > { %s3072_s30 = scalar_select %p2687_p6, 1, 0 }
  0x18   : > { %s3074_s7 = scalar_select %p2692_p8, 1, 0 }
  0x19   : > { %3073 = sst [smem:[#allocation18_spill]] %s3072_s30  ;;  %s223_s9 = sshll.u32 %s2599_s8, 4  ;;  %s2696_s9 = int_to_ptr.vmem [resolvable:$true] %s223_s9 }
  0x1a   : > { %p2277_p9 = pneg %p2692_p8  ;;  %s2600_s11 = smov [#allocation8]  }
  0x1b   : > { %s236_s12 = sshll.u32 %s2600_s11, 4  ;;  %s2601_s13 = smov [#allocation10]   ;;  %s2707_s12 = int_to_ptr.vmem [resolvable:$true] %s236_s12 }
  0x1c   : > { %p2703_p11 = pnand %p2277_p9, %p3055_p1  ;;  %s2709_s14 = sshll.u32 %s2601_s13, 4  ;;  %s250_s14 = int_to_ptr.vmem [resolvable:$true] %s2709_s14 }
  0x1d   : > { %s3076_s2 = sld [smem:[#allocation21_spill]] }
  0x1e   : > { %p2719_p13 = pneg %p2703_p11 }
  0x23   : > { %s2359_s17 = scalar_lea.hbm %s3076_s2, 256 }
  0x24   : > { %p2360_p12 = scmp.ne.s32.totalorder %s3076_s2, %s2359_s17  ;;  %p2366_p5 = scmp.lt.u32.totalorder %s2359_s17, %s3076_s2 }
  0x26   : > { %p2362_p0 = pnand %p2719_p13, %p2360_p12 }
  0x28   : > { %p2363_p3 = pneg %p2362_p0 }
  0x2a   : > { %p2368_p7 = pnand %p2366_p5, %p2363_p3 }
  0x2c   : > { %2371 = shalt.err (!%p2368_p7)
}
  0x2d   : > { %s2372_s11 = scalar_lea.vmem %s2696_s9, 256  ;;  %p2380_p2 = scmp.lt.s32.totalorder %s2696_s9, %s2696_s9 }
  0x2e   : > { %p2373_p9 = scmp.ne.s32.totalorder %s2696_s9, %s2372_s11  ;;  %p2381_p6 = scmp.lt.s32.totalorder %s2372_s11, %s2372_s11 }
  0x30   : > { %p2375_p10 = pnand %p2373_p9, %p2719_p13  ;;  %p2382_p12 = por %p2381_p6, %p2380_p2 }
  0x32   : > { %p2376_p1 = pneg %p2375_p10 }
  0x34   : > { %p2383_p0 = pnand %p2382_p12, %p2376_p1 }
  0x36   : > { %2386 = shalt.err (!%p2383_p0)
}
  0x37   : > { %s3060_s13 = smov 128   ;;  %s3062_s15 = smov 8  }
  0x38   : > { %2280 = dma.hbm_to_vmem [thread:$0]  (!%p2703_p11), %s3076_s2, 256, %s2696_s9, [#allocation6], %s3060_s13, %s3060_s13, %s3062_s15  }
  0x39   : > { %s3078_s3 = sld [smem:[#allocation22_spill]] }
  0x3f   : > { %s2387_s28 = scalar_lea.hbm %s3078_s3, 256 }
  0x40   : > { %p2388_p1 = scmp.ne.s32.totalorder %s3078_s3, %s2387_s28  ;;  %p2394_p10 = scmp.lt.u32.totalorder %s2387_s28, %s3078_s3 }
  0x42   : > { %p2390_p2 = pnand %p2388_p1, %p2719_p13 }
  0x44   : > { %p2391_p6 = pneg %p2390_p2 }
  0x46   : > { %p2396_p3 = pnand %p2394_p10, %p2391_p6 }
  0x48   : > { %2399 = shalt.err (!%p2396_p3)
}
  0x49   : > { %s2400_s9 = scalar_lea.vmem %s2707_s12, 256  ;;  %p2408_p12 = scmp.lt.s32.totalorder %s2707_s12, %s2707_s12 }
  0x4a   : > { %p2401_p5 = scmp.ne.s32.totalorder %s2707_s12, %s2400_s9  ;;  %p2409_p0 = scmp.lt.s32.totalorder %s2400_s9, %s2400_s9 }
  0x4c   : > { %p2403_p7 = pnand %p2401_p5, %p2719_p13  ;;  %p2410_p1 = por %p2409_p0, %p2408_p12 }
  0x4e   : > { %p2404_p9 = pneg %p2403_p7 }
  0x50   : > { %p2411_p2 = pnand %p2410_p1, %p2404_p9 }
  0x52   : > { %2414 = shalt.err (!%p2411_p2)
}
  0x53   : > { %2283 = dma.hbm_to_vmem [thread:$0]  (!%p2703_p11), %s3078_s3, 256, %s2707_s12, [#allocation9], %s3060_s13, %s3060_s13, %s3062_s15  }
  0x54   : > { %s3079_s4 = sld [smem:[#allocation23_spill]] }
  0x5a   : > { %s2415_s18 = scalar_lea.hbm %s3079_s4, 256 }
  0x5b   : > { %p2416_p6 = scmp.ne.s32.totalorder %s3079_s4, %s2415_s18  ;;  %p2422_p5 = scmp.lt.u32.totalorder %s2415_s18, %s3079_s4 }
  0x5d   : > { %p2418_p10 = pnand %p2416_p6, %p2719_p13 }
  0x5f   : > { %p2419_p3 = pneg %p2418_p10 }
  0x61   : > { %p2424_p7 = pnand %p2422_p5, %p2419_p3 }
  0x63   : > { %2427 = shalt.err (!%p2424_p7)
}
  0x64   : > { %s2428_s9 = scalar_lea.vmem %s250_s14, 256  ;;  %p2436_p1 = scmp.lt.s32.totalorder %s250_s14, %s250_s14 }
  0x65   : > { %p2429_p9 = scmp.ne.s32.totalorder %s250_s14, %s2428_s9  ;;  %p2437_p2 = scmp.lt.s32.totalorder %s2428_s9, %s2428_s9 }
  0x67   : > { %p2431_p12 = pnand %p2429_p9, %p2719_p13  ;;  %p2438_p4 = por %p2437_p2, %p2436_p1 }
  0x69   : > { %p2432_p0 = pneg %p2431_p12 }
  0x6b   : > { %p2439_p8 = pnand %p2438_p4, %p2432_p0 }
  0x6d   : > { %2442 = shalt.err (!%p2439_p8)
}
  0x6e   : > { %2286 = dma.hbm_to_vmem [thread:$0]  (!%p2703_p11), %s3079_s4, 256, %s250_s14, [#allocation9], %s3060_s13, %s3060_s13, %s3062_s15  }
  0x6f   : > { %s47_s20 = sadd.s32 1, %s2585_s23  ;;  %s38_s10 = sadd.s32 1, %s2593_s25 }
  0x70   : > { %p54_p4 = scmp.ne.s32.totalorder %s2585_s23, %s2581_s22  ;;  %p40_p8 = scmp.ge.s32.totalorder %s38_s10, 2 }
  0x71   : > { %p55_p13 = scmp.eq.s32.totalorder %s2597_s26, 0  ;;  %p3080_p6 = scmp.eq.s32.totalorder %s2673_s27, 1 }
  0x72   : > { %p2301_p3 = scmp.lt.s32.totalorder %s2597_s26, 2  ;;  %s3104_s10 = smov (%p40_p8, %s38_s10), 0 }
  0x73   : > { %p2798_p10 = por %p3080_p6, %p54_p4  ;;  %p56_p5 = por %p55_p13, %p54_p4 }
  0x74   : > { %s266_s16 = sand.u32 1, %s2585_s23   ;;  %s42_s17 = ssub.s32 %s2593_s25, %s3104_s10 }
  0x75   : > { %p45_p7 = scmp.eq.s32.totalorder %s42_s17, 0  ;;  %s1952_s14 = sshll.u32 %s266_s16, 6 }
  0x76   : > { %s2001_s18 = sshll.u32 %s2593_s25, 10  ;;  %s3082_s0 = sld [smem:[#allocation19_spill]] }
  0x77   : > { %s2810_s19 = scalar_select %p45_p7, %s2585_s23, %s47_s20  }
  0x78   : > { %s270_s9 = scalar_lea.vmem [#allocation2], %s1952_s14  ;;  %p2821_p11 = pnand %p2301_p3, %p56_p5 }
  0x79   : > { %s280_s12 = sshll.u32 %s270_s9, 4  ;;  %s3084_s1 = sld [smem:[#allocation20_spill]]  ;;  %s2817_s12 = int_to_ptr.vmem [resolvable:$true] %s280_s12 }
  0x7a   : > { %s294_s8 = scalar_lea.vmem [#allocation5], %s1952_s14  ;;  %s2832_s15 = scalar_lea.sflag [#allocation3], %s266_s16 }
  0x7b   : > { %s2830_s13 = sshll.u32 %s294_s8, 4  ;;  %p2445_p12 = pneg %p2821_p11  ;;  %s2864_s13 = int_to_ptr.vmem [resolvable:$true] %s2830_s13 }
  0x7c   : > { %s2815_s11 = scalar_lea.hbm %s3082_s0, %s2001_s18  ;;  %s2448_s20 = scalar_lea.hbm %s3082_s0, 2048 }
  0x7d   : > { %s2443_s9 = scalar_lea.hbm %s2815_s11, 1024  ;;  %p2449_p2 = scmp.lt.u32.totalorder %s2815_s11, %s3082_s0 }
  0x7e   : > { %p2444_p9 = scmp.ne.s32.totalorder %s2815_s11, %s2443_s9  ;;  %p2450_p4 = scmp.lt.u32.totalorder %s2448_s20, %s2443_s9 }
  0x7f   : > { %s2828_s28 = scalar_lea.hbm %s3084_s1, %s2001_s18  ;;  %p2452_p13 = scmp.lt.u32.totalorder %s2443_s9, %s2815_s11 }
  0x80   : > { %p2446_p0 = pnand %p2445_p12, %p2444_p9  ;;  %p2451_p8 = por %p2450_p4, %p2449_p2 }
  0x82   : > { %p2447_p1 = pneg %p2446_p0  ;;  %p2453_p6 = por %p2452_p13, %p2451_p8 }
  0x84   : > { %p2454_p3 = pnand %p2453_p6, %p2447_p1 }
  0x86   : > { %2457 = shalt.err (!%p2454_p3)
}
  0x87   : > { %s2458_s16 = scalar_lea.vmem %s2817_s12, 1024  ;;  %s2604_s2 = smov [#allocation2]  }
  0x88   : > { %p2459_p5 = scmp.ne.s32.totalorder %s2817_s12, %s2458_s16  ;;  %s2463_s3 = sshll.u32 %s2604_s2, 4  ;;  %s2464_s3 = int_to_ptr.vmem [resolvable:$false] %s2463_s3 }
  0x89   : > { %s2465_s14 = scalar_lea.vmem %s2464_s3, 2048  ;;  %p2466_p0 = scmp.lt.s32.totalorder %s2817_s12, %s2464_s3 }
  0x8a   : > { %p2461_p7 = pnand %p2459_p5, %p2445_p12  ;;  %p2467_p2 = scmp.lt.s32.totalorder %s2465_s14, %s2458_s16 }
  0x8c   : > { %p2462_p9 = pneg %p2461_p7  ;;  %p2468_p4 = por %p2467_p2, %p2466_p0 }
  0x8e   : > { %p2469_p8 = pnand %p2468_p4, %p2462_p9 }
  0x90   : > { %2472 = shalt.err (!%p2469_p8)
}
  0x91   : > { %s3085_s8 = smov 8   ;;  %s3086_s9 = smov 128  }
  0x92   : > { %2290 = dma.hbm_to_vmem [thread:$0]  (!%p2821_p11), %s2815_s11, 1024, %s2817_s12, %s2832_s15, %s3086_s9, %s3086_s9, %s3085_s8  }
  0x93   : > { %s290_s20 = sand.u32 1, %s2597_s26   ;;  %s2473_s18 = scalar_lea.hbm %s2828_s28, 1024 }
  0x94   : > { %s2867_s17 = scalar_lea.sflag [#allocation6], %s290_s20  ;;  %p2474_p1 = scmp.ne.s32.totalorder %s2828_s28, %s2473_s18 }
  0x95   : > { %s2478_s3 = scalar_lea.hbm %s3084_s1, 2048  ;;  %p2479_p3 = scmp.lt.u32.totalorder %s2828_s28, %s3084_s1 }
  0x96   : > { %p2476_p13 = pnand %p2474_p1, %p2445_p12  ;;  %p2480_p5 = scmp.lt.u32.totalorder %s2478_s3, %s2473_s18 }
  0x97   : > { %p2482_p9 = scmp.lt.u32.totalorder %s2473_s18, %s2828_s28 }
  0x98   : > { %p2477_p6 = pneg %p2476_p13  ;;  %p2481_p7 = por %p2480_p5, %p2479_p3 }
  0x9a   : > { %p2483_p0 = por %p2482_p9, %p2481_p7 }
  0x9c   : > { %p2484_p2 = pnand %p2483_p0, %p2477_p6 }
  0x9e   : > { %2487 = shalt.err (!%p2484_p2)
}
  0x9f   : > { %s2488_s15 = scalar_lea.vmem %s2864_s13, 1024  ;;  %s2605_s11 = smov [#allocation5]  }
  0xa0   : > { %p2489_p4 = scmp.ne.s32.totalorder %s2864_s13, %s2488_s15  ;;  %s2493_s12 = sshll.u32 %s2605_s11, 4  ;;  %s2494_s12 = int_to_ptr.vmem [resolvable:$false] %s2493_s12 }
  0xa1   : > { %s2495_s0 = scalar_lea.vmem %s2494_s12, 2048  ;;  %p2496_p13 = scmp.lt.s32.totalorder %s2864_s13, %s2494_s12 }
  0xa2   : > { %p2491_p8 = pnand %p2489_p4, %p2445_p12  ;;  %p2497_p3 = scmp.lt.s32.totalorder %s2495_s0, %s2488_s15 }
  0xa4   : > { %p2492_p1 = pneg %p2491_p8  ;;  %p2498_p5 = por %p2497_p3, %p2496_p13 }
  0xa6   : > { %p2499_p7 = pnand %p2498_p5, %p2492_p1 }
  0xa8   : > { %2502 = shalt.err (!%p2499_p7)
}
  0xa9   : > { %2293 = dma.hbm_to_vmem [thread:$0]  (!%p2821_p11), %s2828_s28, 1024, %s2864_s13, %s2867_s17, %s3086_s9, %s3086_s9, %s3085_s8  }
  0xaa   : > { %p3087_p12 = scmp.ne.s32.totalorder %s3074_s7, 0 }
  0xab   : > { %s2899_s20 = sand.u32 (!%p3087_p12), 1, %s2581_s22   ;;  %p3088_p6 = scmp.ne.s32.totalorder (!%p3087_p12), %s3071_s29, 0 }
  0xac   : > { %316 = sbr.rel (%p3087_p12) target bundleno = 883 (0x373), region = 44  ;;  %s1959_s18 = sshll.u32 (!%p3087_p12), %s2899_s20, 6 }
  0xad   : > { %s319_s16 = scalar_lea.sflag (!%p3087_p12), [#allocation3], %s2899_s20  ;;  %s2903_s2 = scalar_lea.vmem (!%p3087_p12), [#allocation2], %s1959_s18 }
  0xb3   : > { %2556 = dma.done.wait (%p3088_p6), %s319_s16, 1024  }
  0xb4   : > { %2558 = vsyncadd (%p3088_p6), %s319_s16, 4294966272  ;;  %s327_s13 = sand.u32 1, %s2673_s27   ;;  %s2910_s21 = scalar_lea.vmem [#allocation5], %s1959_s18 }
  0xb5   : > { %s328_s7 = scalar_lea.sflag [#allocation6], %s327_s13 }
  0xb6   : > { %2560 = dma.done.wait (%p3088_p6), %s328_s7, 1024  }
  0xb7   : > { %2562 = vsyncadd (%p3088_p6), %s328_s7, 4294966272  ;;  %p3089_p11 = scmp.eq.s32.totalorder %s2673_s27, 0 }
  0xb9   : > { %2564 = dma.done.wait (%p3089_p11), [#allocation6], 256   ;;  %p3090_p9 = pmov %p3089_p11 }
  0xbb   : > { %2566 = vsyncadd (%p3090_p9), [#allocation6], 4294967040  ;;  %p3091_p0 = pmov %p3090_p9 }
  0xbd   : > { %2568 = dma.done.wait (%p3091_p0), [#allocation9], 512   ;;  %p3092_p2 = pmov %p3091_p0 }
  0xbe   : > { %v403_v0 = vld [vmem:[#allocation7] sm:$0xff]  ;;  %v404_v1 = vld [vmem:[#allocation7 + $0x8] sm:$0xff]  ;;  %vm411_vm0 = vcmask 130048   ;;  %v381_v9 = vld [vmem:[%s2903_s2 + $0x10] sm:$0xff]  ;;  %s3093_s5 = sld [smem:[#allocation24_spill]]  ;;  %s1964_s18 = sshll.u32 %s2899_s20, 3 }
  0xbf   : > { %2570 = vsyncadd (%p3092_p2), [#allocation9], 4294966784  ;;  %v379_v2 = vld [vmem:[%s2903_s2] sm:$0xff]  ;;  %v2179_v3 = vpack.c.bf16 %v404_v1, %v403_v0  ;;  %v380_v4 = vld [vmem:[%s2903_s2 + $0x8] sm:$0xff]  ;;  %s376_s29 = scalar_lea.vmem [#allocation11], %s1964_s18 }
  0xc0   : > { %v387_v5 = vld [vmem:[%s2910_s21] sm:$0xff]  ;;  %v388_v6 = vld [vmem:[%s2910_s21 + $0x8] sm:$0xff]  ;;  %v389_v10 = vld [vmem:[%s2910_s21 + $0x10] sm:$0xff]  ;;  %s1809_s28 = sshll.u32 %s376_s29, 4  ;;  %s3001_s28 = int_to_ptr.vmem [resolvable:$true] %s1809_s28 }
  0xc1   : > { %v395_v7 = vsub.f32 %v379_v2, %v387_v5  ;;  %v396_v8 = vsub.f32 %v380_v4, %v388_v6  ;;  %2180 = vmatprep.subr.bf16.mxu0 %v2179_v3  ;;  %v382_v11 = vld [vmem:[%s2903_s2 + $0x18] sm:$0xff]  ;;  %v407_v14 = vld [vmem:[#allocation10] sm:$0xff]  ;;  %v397_v15 = vsub.f32 %v381_v9, %v389_v10  ;;  %v408_v17 = vld [vmem:[#allocation10 + $0x8] sm:$0xff] }
  0xc2   : > { %v390_v12 = vld [vmem:[%s2910_s21 + $0x18] sm:$0xff]  ;;  %2182 = vmatpush3.bf16.msra.mxu0 %v2179_v3  ;;  %v383_v19 = vld [vmem:[%s2903_s2 + $0x20] sm:$0xff]  ;;  %v384_v21 = vld [vmem:[%s2903_s2 + $0x28] sm:$0xff] }
  0xc3   : > { %2071 = vmatprep.mubr.msk.f32.mxu0 %vm411_vm0, %v395_v7  ;;  %v2187_v13 = vpack.c.bf16 %v396_v8, %v395_v7  ;;  %v398_v16 = vsub.f32 %v382_v11, %v390_v12  ;;  %v391_v20 = vld [vmem:[%s2910_s21 + $0x20] sm:$0xff]  ;;  %v392_v22 = vld [vmem:[%s2910_s21 + $0x28] sm:$0xff]  ;;  %v385_v26 = vld [vmem:[%s2903_s2 + $0x30] sm:$0xff] }
  0xc4   : > { %v399_v23 = vsub.f32 %v383_v19, %v391_v20  ;;  %v400_v24 = vsub.f32 %v384_v21, %v392_v22  ;;  %v393_v27 = vld [vmem:[%s2910_s21 + $0x30] sm:$0xff]  ;;  %v386_v28 = vld [vmem:[%s2903_s2 + $0x38] sm:$0xff]  ;;  %v409_v33 = vld [vmem:[%s3093_s5] sm:$0xff] }
  0xc5   : > { %2188 = vmatprep.subr.bf16.mxu0 %v2187_v13  ;;  %2072 = vmatmul.mubr.msk.f32.vlgmr.msra.gmra.mrb[0].mxu0 %vm411_vm0, %v396_v8  ;;  %v2203_v18 = vpack.c.bf16 %v398_v16, %v397_v15  ;;  %v394_v29 = vld [vmem:[%s2910_s21 + $0x38] sm:$0xff]  ;;  %v401_v30 = vsub.f32 %v385_v26, %v393_v27  ;;  %v405_v34 = vld [vmem:[#allocation8] sm:$0xff]  ;;  %v410_v42 = vld [vmem:[%s3093_s5 + $0x8] sm:$0xff]  ;;  %s1998_s21 = sshll.u32 %s2589_s24, 7  ;;  %s2606_s24 = smov [#allocation11]  }
  0xc6   : > { %2190 = vmatpush3.bf16.msra.mxu0 %v2187_v13  ;;  %2085 = vmatprep.mubr.msk.f32.mxu0 %vm411_vm0, %v407_v14  ;;  %v2219_v25 = vpack.c.bf16 %v400_v24, %v399_v23  ;;  %v402_v31 = vsub.f32 %v386_v28, %v394_v29  ;;  %v406_v35 = vld [vmem:[#allocation8 + $0x8] sm:$0xff] }
  0xc7   : > { %2196 = vmatprep.subr.bf16.mxu0 %v2179_v3  ;;  %2078 = vmatprep.mubr.msk.f32.mxu1 %vm411_vm0, %v409_v33  ;;  %v2191_v39 = vpack.c.bf16 %v406_v35, %v405_v34 }
  0xc8   : > { %v2235_v32 = vpack.c.bf16 %v402_v31, %v401_v30 }
  0xc9   : > { %2086 = vmatmul.mubr.msk.f32.vlgmr.msra.gmra.mrb[2].mxu0 %vm411_vm0, %v408_v17 }
  0xca   : > { %2198 = vmatpush3.bf16.msra.mxu0 %v2179_v3  ;;  %2099 = vmatprep.mubr.msk.f32.mxu0 %vm411_vm0, %v397_v15 }
  0xcb   : > { %2204 = vmatprep.subr.bf16.mxu0 %v2203_v18 }
  0xcd   : > { %2100 = vmatmul.mubr.msk.f32.vlgmr.msra.gmra.mrb[4].mxu0 %vm411_vm0, %v398_v16 }
  0xce   : > { %2206 = vmatpush3.bf16.msra.mxu0 %v2203_v18  ;;  %2113 = vmatprep.mubr.msk.f32.mxu0 %vm411_vm0, %v407_v14 }
  0xcf   : > { %2212 = vmatprep.subr.bf16.mxu0 %v2179_v3 }
  0xd1   : > { %2114 = vmatmul.mubr.msk.f32.vlgmr.msra.gmra.mrb[6].mxu0 %vm411_vm0, %v408_v17 }
  0xd2   : > { %2214 = vmatpush3.bf16.msra.mxu0 %v2179_v3  ;;  %2127 = vmatprep.mubr.msk.f32.mxu0 %vm411_vm0, %v399_v23 }
  0xd3   : > { %2220 = vmatprep.subr.bf16.mxu0 %v2219_v25 }
  0xd5   : > { %2128 = vmatmul.mubr.msk.f32.vlgmr.msra.gmra.mrb[8].mxu0 %vm411_vm0, %v400_v24 }
  0xd6   : > { %2222 = vmatpush3.bf16.msra.mxu0 %v2219_v25  ;;  %2141 = vmatprep.mubr.msk.f32.mxu0 %vm411_vm0, %v407_v14 }
  0xd7   : > { %2228 = vmatprep.subr.bf16.mxu0 %v2179_v3 }
  0xd9   : > { %2142 = vmatmul.mubr.msk.f32.vlgmr.msra.gmra.mrb[10].mxu0 %vm411_vm0, %v408_v17 }
  0xda   : > { %2230 = vmatpush3.bf16.msra.mxu0 %v2179_v3  ;;  %2155 = vmatprep.mubr.msk.f32.mxu0 %vm411_vm0, %v401_v30 }
  0xdb   : > { %2236 = vmatprep.subr.bf16.mxu0 %v2235_v32 }
  0xdd   : > { %2156 = vmatmul.mubr.msk.f32.vlgmr.msra.gmra.mrb[12].mxu0 %vm411_vm0, %v402_v31 }
  0xde   : > { %2238 = vmatpush3.bf16.msra.mxu0 %v2235_v32  ;;  %2169 = vmatprep.mubr.msk.f32.mxu0 %vm411_vm0, %v407_v14 }
  0xe1   : > { %2170 = vmatmul.mubr.msk.f32.vlgmr.msra.gmra.mrb[14].mxu0 %vm411_vm0, %v408_v17 }
 0x198   : > { %v2073_v36 = vpop.f32.mrb[0].mxu0 }
 0x199   : > { %v484_v37 = vpop.f32.mrb[1].mxu0 }
 0x19a   : > { %v2183_v38 = vpack.c.bf16 %v2073_v36, %v484_v37 }
 0x19c   : > { %2184 = vmatprep.subr.bf16.mxu1 %v2183_v38  ;;  %v2087_v40 = vpop.f32.mrb[2].mxu0 }
 0x19d   : > { %2186 = vmatpush3.bf16.msra.mxu1 %v2183_v38  ;;  %v646_v41 = vpop.f32.mrb[3].mxu0 }
 0x19e   : > { %2192 = vmatprep.subr.bf16.mxu1 %v2191_v39 }
 0x1a0   : > { %2079 = vmatmul.mubr.msk.f32.vlgmr.msra.gmra.mrb[0].mxu1 %vm411_vm0, %v410_v42  ;;  %v2101_v43 = vpop.f32.mrb[4].mxu0 }
 0x1a1   : > { %2194 = vmatpush3.bf16.msra.mxu1 %v2191_v39  ;;  %2092 = vmatprep.mubr.msk.f32.mxu1 %vm411_vm0, %v646_v41  ;;  %v838_v44 = vpop.f32.mrb[5].mxu0 }
 0x1a2   : > { %v2199_v45 = vpack.c.bf16 %v2101_v43, %v838_v44 }
 0x1a4   : > { %2093 = vmatmul.mubr.msk.f32.vlgmr.msra.gmra.mrb[2].mxu1 %vm411_vm0, %v2087_v40  ;;  %2200 = vmatprep.subr.bf16.mxu1 %v2199_v45  ;;  %v2115_v46 = vpop.f32.mrb[6].mxu0 }
 0x1a5   : > { %2202 = vmatpush3.bf16.msra.mxu1 %v2199_v45  ;;  %v988_v47 = vpop.f32.mrb[7].mxu0  ;;  %2106 = vmatprep.mubr.msk.f32.mxu1 %vm411_vm0, %v409_v33 }
 0x1a6   : > { %2208 = vmatprep.subr.bf16.mxu1 %v2191_v39 }
 0x1a8   : > { %2107 = vmatmul.mubr.msk.f32.vlgmr.msra.gmra.mrb[4].mxu1 %vm411_vm0, %v410_v42  ;;  %v2129_v48 = vpop.f32.mrb[8].mxu0 }
 0x1a9   : > { %2210 = vmatpush3.bf16.msra.mxu1 %v2191_v39  ;;  %2120 = vmatprep.mubr.msk.f32.mxu1 %vm411_vm0, %v988_v47  ;;  %v1180_v49 = vpop.f32.mrb[9].mxu0 }
 0x1aa   : > { %v2215_v50 = vpack.c.bf16 %v2129_v48, %v1180_v49 }
 0x1ac   : > { %2121 = vmatmul.mubr.msk.f32.vlgmr.msra.gmra.mrb[6].mxu1 %vm411_vm0, %v2115_v46  ;;  %2216 = vmatprep.subr.bf16.mxu1 %v2215_v50  ;;  %v2143_v51 = vpop.f32.mrb[10].mxu0 }
 0x1ad   : > { %2218 = vmatpush3.bf16.msra.mxu1 %v2215_v50  ;;  %v1330_v52 = vpop.f32.mrb[11].mxu0  ;;  %2134 = vmatprep.mubr.msk.f32.mxu1 %vm411_vm0, %v409_v33 }
 0x1ae   : > { %2224 = vmatprep.subr.bf16.mxu1 %v2191_v39 }
 0x1b0   : > { %2135 = vmatmul.mubr.msk.f32.vlgmr.msra.gmra.mrb[8].mxu1 %vm411_vm0, %v410_v42  ;;  %v2157_v53 = vpop.f32.mrb[12].mxu0 }
 0x1b1   : > { %2226 = vmatpush3.bf16.msra.mxu1 %v2191_v39  ;;  %2148 = vmatprep.mubr.msk.f32.mxu1 %vm411_vm0, %v1330_v52  ;;  %v1522_v54 = vpop.f32.mrb[13].mxu0 }
 0x1b2   : > { %v2231_v55 = vpack.c.bf16 %v2157_v53, %v1522_v54 }
 0x1b4   : > { %2149 = vmatmul.mubr.msk.f32.vlgmr.msra.gmra.mrb[10].mxu1 %vm411_vm0, %v2143_v51  ;;  %2232 = vmatprep.subr.bf16.mxu1 %v2231_v55  ;;  %v2171_v56 = vpop.f32.mrb[14].mxu0 }
 0x1b5   : > { %2234 = vmatpush3.bf16.msra.mxu1 %v2231_v55  ;;  %2162 = vmatprep.mubr.msk.f32.mxu1 %vm411_vm0, %v409_v33  ;;  %v1672_v57 = vpop.f32.mrb[15].mxu0 }
 0x1b6   : > { %2240 = vmatprep.subr.bf16.mxu1 %v2191_v39 }
 0x1b8   : > { %2163 = vmatmul.mubr.msk.f32.vlgmr.msra.gmra.mrb[12].mxu1 %vm411_vm0, %v410_v42 }
 0x1b9   : > { %2242 = vmatpush3.bf16.msra.mxu1 %v2191_v39  ;;  %2176 = vmatprep.mubr.msk.f32.mxu1 %vm411_vm0, %v1672_v57 }
 0x1bc   : > { %2177 = vmatmul.mubr.msk.f32.vlgmr.msra.gmra.mrb[14].mxu1 %vm411_vm0, %v2171_v56 }
 0x273   : > { %v2080_v58 = vpop.f32.mrb[0].mxu1 }
 0x274   : > { %v737_v59 = vand.u32 2147483647, %v2080_v58  ;;  %v565_v60 = vpop.f32.mrb[1].mxu1 }
 0x275   : > { %v736_v61 = vand.u32 2147483647, %v565_v60 }
 0x276   : > { %v739_v62 = vsel %vm411_vm0, %v737_v59, 0.0 }
 0x277   : > { %v2094_v63 = vpop.f32.mrb[2].mxu1  ;;  %v738_v0 = vsel %vm411_vm0, %v736_v61, 0.0 }
 0x278   : > { %v752_v1 = vand.u32 2147483647, %v2094_v63  ;;  %v727_v2 = vpop.f32.mrb[3].mxu1  ;;  %v740_v3 = vadd.f32 %v739_v62, %v738_v0 }
 0x279   : > { %v751_v4 = vand.u32 2147483647, %v727_v2 }
 0x27a   : > { %741 = vadd.xlane.f32.xlu0 %v740_v3  ;;  %v754_v5 = vsel %vm411_vm0, %v752_v1, 0.0 }
 0x27b   : > { %v2108_v6 = vpop.f32.mrb[4].mxu1  ;;  %v753_v7 = vsel %vm411_vm0, %v751_v4, 0.0 }
 0x27c   : > { %v1079_v8 = vand.u32 2147483647, %v2108_v6  ;;  %v913_v9 = vpop.f32.mrb[5].mxu1  ;;  %v755_v10 = vadd.f32 %v754_v5, %v753_v7 }
 0x27d   : > { %v1078_v11 = vand.u32 2147483647, %v913_v9 }
 0x27e   : > { %756 = vadd.xlane.f32.xlu0 %v755_v10  ;;  %v1081_v12 = vsel %vm411_vm0, %v1079_v8, 0.0 }
 0x27f   : > { %v2122_v13 = vpop.f32.mrb[6].mxu1  ;;  %v1080_v14 = vsel %vm411_vm0, %v1078_v11, 0.0 }
 0x280   : > { %v1094_v15 = vand.u32 2147483647, %v2122_v13  ;;  %v1069_v16 = vpop.f32.mrb[7].mxu1  ;;  %v1082_v17 = vadd.f32 %v1081_v12, %v1080_v14 }
 0x281   : > { %v1093_v18 = vand.u32 2147483647, %v1069_v16 }
 0x282   : > { %1083 = vadd.xlane.f32.xlu1 %v1082_v17  ;;  %v1096_v19 = vsel %vm411_vm0, %v1094_v15, 0.0 }
 0x283   : > { %v2136_v20 = vpop.f32.mrb[8].mxu1  ;;  %v1095_v21 = vsel %vm411_vm0, %v1093_v18, 0.0 }
 0x284   : > { %v1421_v22 = vand.u32 2147483647, %v2136_v20  ;;  %v1255_v23 = vpop.f32.mrb[9].mxu1  ;;  %v1097_v24 = vadd.f32 %v1096_v19, %v1095_v21 }
 0x285   : > { %v1420_v25 = vand.u32 2147483647, %v1255_v23 }
 0x286   : > { %1098 = vadd.xlane.f32.xlu1 %v1097_v24  ;;  %v1423_v26 = vsel %vm411_vm0, %v1421_v22, 0.0 }
 0x287   : > { %v2150_v27 = vpop.f32.mrb[10].mxu1  ;;  %v1422_v28 = vsel %vm411_vm0, %v1420_v25, 0.0 }
 0x288   : > { %v1436_v29 = vand.u32 2147483647, %v2150_v27  ;;  %v1411_v30 = vpop.f32.mrb[11].mxu1  ;;  %v1424_v31 = vadd.f32 %v1423_v26, %v1422_v28 }
 0x289   : > { %v1435_v32 = vand.u32 2147483647, %v1411_v30 }
 0x28a   : > { %1425 = vadd.xlane.f32.xlu0 %v1424_v31  ;;  %v1438_v33 = vsel %vm411_vm0, %v1436_v29, 0.0 }
 0x28b   : > { %v2164_v34 = vpop.f32.mrb[12].mxu1  ;;  %v1437_v35 = vsel %vm411_vm0, %v1435_v32, 0.0 }
 0x28c   : > { %v1763_v36 = vand.u32 2147483647, %v2164_v34  ;;  %v1597_v37 = vpop.f32.mrb[13].mxu1  ;;  %v1439_v38 = vadd.f32 %v1438_v33, %v1437_v35 }
 0x28d   : > { %v1762_v39 = vand.u32 2147483647, %v1597_v37 }
 0x28e   : > { %1440 = vadd.xlane.f32.xlu1 %v1439_v38  ;;  %v1765_v40 = vsel %vm411_vm0, %v1763_v36, 0.0 }
 0x28f   : > { %v2178_v41 = vpop.f32.mrb[14].mxu1  ;;  %v1764_v42 = vsel %vm411_vm0, %v1762_v39, 0.0 }
 0x290   : > { %v1778_v43 = vand.u32 2147483647, %v2178_v41  ;;  %v1753_v44 = vpop.f32.mrb[15].mxu1  ;;  %v1766_v45 = vadd.f32 %v1765_v40, %v1764_v42 }
 0x291   : > { %v1777_v46 = vand.u32 2147483647, %v1753_v44 }
 0x292   : > { %1767 = vadd.xlane.f32.xlu0 %v1766_v45  ;;  %v1780_v47 = vsel %vm411_vm0, %v1778_v43, 0.0 }
 0x293   : > { %v1779_v48 = vsel %vm411_vm0, %v1777_v46, 0.0 }
 0x294   : > { %v1781_v49 = vadd.f32 %v1780_v47, %v1779_v48 }
 0x296   : > { %1782 = vadd.xlane.f32.xlu1 %v1781_v49 }
 0x307   : > { %v742_v50 = vpop.xlane.xlu0 %741 }
 0x308   : > { %v743_v51 = vrot.slane %v742_v50, 4 }
 0x30a   : > { %v744_v52 = vadd.f32 %v743_v51, %v742_v50 }
 0x30b   : > { %v757_v53 = vpop.xlane.xlu0 %756 }
 0x30c   : > { %v745_v54 = vrot.slane %v744_v52, 2  ;;  %v758_v55 = vrot.slane %v757_v53, 4 }
 0x30e   : > { %v759_v56 = vadd.f32 %v758_v55, %v757_v53  ;;  %v746_v57 = vadd.f32 %v745_v54, %v744_v52 }
 0x30f   : > { %v1084_v58 = vpop.xlane.xlu1 %1083 }
 0x310   : > { %v760_v59 = vrot.slane %v759_v56, 2  ;;  %v1085_v60 = vrot.slane %v1084_v58, 4  ;;  %v747_v61 = vrot.slane %v746_v57, 1 }
 0x312   : > { %v1086_v62 = vadd.f32 %v1085_v60, %v1084_v58  ;;  %v748_v63 = vadd.f32 %v747_v61, %v746_v57  ;;  %v761_v0 = vadd.f32 %v760_v59, %v759_v56 }
 0x313   : > { %v1099_v1 = vpop.xlane.xlu1 %1098 }
 0x314   : > { %v1087_v2 = vrot.slane %v1086_v62, 2  ;;  %v1100_v3 = vrot.slane %v1099_v1, 4  ;;  %2243 = vpush %v748_v63  ;;  %v762_v4 = vrot.slane %v761_v0, 1 }
 0x316   : > { %v1101_v5 = vadd.f32 %v1100_v3, %v1099_v1  ;;  %v763_v6 = vadd.f32 %v762_v4, %v761_v0  ;;  %v1088_v7 = vadd.f32 %v1087_v2, %v1086_v62 }
 0x317   : > { %v1426_v8 = vpop.xlane.xlu0 %1425 }
 0x318   : > { %v1102_v9 = vrot.slane %v1101_v5, 2  ;;  %v1427_v10 = vrot.slane %v1426_v8, 4  ;;  %2245 = vpush %v763_v6  ;;  %v1089_v11 = vrot.slane %v1088_v7, 1 }
 0x31a   : > { %v1428_v12 = vadd.f32 %v1427_v10, %v1426_v8  ;;  %v1090_v13 = vadd.f32 %v1089_v11, %v1088_v7  ;;  %v1103_v14 = vadd.f32 %v1102_v9, %v1101_v5 }
 0x31b   : > { %v1441_v15 = vpop.xlane.xlu1 %1440 }
 0x31c   : > { %v1429_v16 = vrot.slane %v1428_v12, 2  ;;  %v1442_v17 = vrot.slane %v1441_v15, 4  ;;  %2247 = vpush %v1090_v13  ;;  %v1104_v18 = vrot.slane %v1103_v14, 1 }
 0x31e   : > { %v1443_v19 = vadd.f32 %v1442_v17, %v1441_v15  ;;  %v1105_v20 = vadd.f32 %v1104_v18, %v1103_v14  ;;  %v1430_v21 = vadd.f32 %v1429_v16, %v1428_v12 }
 0x31f   : > { %v1768_v22 = vpop.xlane.xlu0 %1767 }
 0x320   : > { %v1444_v23 = vrot.slane %v1443_v19, 2  ;;  %v1769_v24 = vrot.slane %v1768_v22, 4  ;;  %2249 = vpush %v1105_v20  ;;  %v1431_v25 = vrot.slane %v1430_v21, 1 }
 0x322   : > { %v1770_v26 = vadd.f32 %v1769_v24, %v1768_v22  ;;  %v1432_v27 = vadd.f32 %v1431_v25, %v1430_v21  ;;  %v1445_v28 = vadd.f32 %v1444_v23, %v1443_v19 }
 0x323   : > { %v1783_v29 = vpop.xlane.xlu1 %1782 }
 0x324   : > { %v1771_v30 = vrot.slane %v1770_v26, 2  ;;  %v1784_v31 = vrot.slane %v1783_v29, 4  ;;  %2251 = vpush %v1432_v27  ;;  %v1446_v32 = vrot.slane %v1445_v28, 1 }
 0x326   : > { %v1772_v33 = vadd.f32 %v1771_v30, %v1770_v26  ;;  %v1785_v34 = vadd.f32 %v1784_v31, %v1783_v29  ;;  %v1447_v35 = vadd.f32 %v1446_v32, %v1445_v28 }
 0x328   : > { %v1786_v36 = vrot.slane %v1785_v34, 2  ;;  %2253 = vpush %v1447_v35  ;;  %v1773_v37 = vrot.slane %v1772_v33, 1 }
 0x32a   : > { %v1787_v38 = vadd.f32 %v1786_v36, %v1785_v34  ;;  %v1774_v39 = vadd.f32 %v1773_v37, %v1772_v33 }
 0x32c   : > { %2255 = vpush %v1774_v39  ;;  %v1788_v40 = vrot.slane %v1787_v38, 1 }
 0x32e   : > { %v1789_v41 = vadd.f32 %v1788_v40, %v1787_v38 }
 0x330   : > { %2257 = vpush %v1789_v41 }
 0x345   : > { %s2244_s9 = spop %2243 }
 0x349   : > { %s2246_s17 = spop %2245 }
 0x34a   : > { %s765_s14 = sadd.f32 %s2246_s17, %s2244_s9  ;;  %s2999_s9 = scalar_lea.hbm %s3054_s6, %s1998_s21 }
 0x34b   : > { %s1795_s17 = scalar_lea.sflag [#allocation4], %s2899_s20 }
 0x34d   : > { %s2248_s3 = spop %2247 }
 0x34e   : > { %s1092_s11 = sadd.f32 %s2248_s3, %s765_s14  ;;  %s2503_s3 = scalar_lea.vmem %s3001_s28, 128 }
 0x34f   : > { %p2504_p4 = scmp.ne.s32.totalorder %s3001_s28, %s2503_s3  ;;  %s2507_s14 = sshll.u32 %s2606_s24, 4  ;;  %s2508_s14 = int_to_ptr.vmem [resolvable:$false] %s2507_s14 }
 0x350   : > { %p2510_p13 = scmp.lt.s32.totalorder %s3001_s28, %s2508_s14 }
 0x351   : > { %s2250_s15 = spop %2249  ;;  %p2505_p8 = pnand %p2504_p4, %p2798_p10 }
 0x352   : > { %s1107_s0 = sadd.f32 %s2250_s15, %s1092_s11  ;;  %s2509_s15 = scalar_lea.vmem %s2508_s14, 256 }
 0x353   : > { %p2506_p1 = pneg %p2505_p8  ;;  %p2511_p3 = scmp.lt.s32.totalorder %s2509_s15, %s2503_s3 }
 0x355   : > { %s2252_s12 = spop %2251  ;;  %p2512_p5 = por %p2511_p3, %p2510_p13 }
 0x356   : > { %s1434_s2 = sadd.f32 %s2252_s12, %s1107_s0 }
 0x357   : > { %p2513_p7 = pnand %p2512_p5, %p2506_p1 }
 0x359   : > { %s2254_s16 = spop %2253 }
 0x35a   : > { %s1449_s7 = sadd.f32 %s2254_s16, %s1434_s2 }
 0x35d   : > { %s2256_s13 = spop %2255 }
 0x35e   : > { %s1776_s27 = sadd.f32 %s2256_s13, %s1449_s7 }
 0x361   : > { %s2258_s8 = spop %2257 }
 0x362   : > { %s1791_s1 = sadd.f32 %s2258_s8, %s1776_s27 }
 0x364   : > { %v1792_v42 = vstv %s1791_s1 }
 0x365   : > { %1793 = vst [vmem:[%s376_s29] sm:$0xff] %v1792_v42 }
 0x366   : > { %2516 = shalt.err (!%p2513_p7)
}
 0x367   : > { %s2517_s1 = scalar_lea.hbm %s2999_s9, 128  ;;  %s2521_s20 = scalar_lea.hbm %s3054_s6, 256 }
 0x368   : > { %p2518_p12 = scmp.ne.s32.totalorder %s2999_s9, %s2517_s1  ;;  %p2522_p9 = scmp.lt.u32.totalorder %s2999_s9, %s3054_s6 }
 0x369   : > { %p2523_p0 = scmp.lt.u32.totalorder %s2521_s20, %s2517_s1  ;;  %p2525_p4 = scmp.lt.u32.totalorder %s2517_s1, %s2999_s9 }
 0x36a   : > { %p2519_p6 = pnand %p2518_p12, %p2798_p10 }
 0x36b   : > { %p2524_p2 = por %p2523_p0, %p2522_p9 }
 0x36c   : > { %p2520_p11 = pneg %p2519_p6 }
 0x36d   : > { %p2526_p8 = por %p2525_p4, %p2524_p2 }
 0x36f   : > { %p2527_p1 = pnand %p2526_p8, %p2520_p11 }
 0x371   : > { %2530 = shalt.err (!%p2527_p1)
}
 0x372   : > { %2275 = dma.vmem_to_hbm [thread:$0]  (%p2798_p10), %s3001_s28, 128, %s2999_s9, %s1795_s17  }
 0x373 PF: > { %s3094_s0 = sld [smem:[#allocation17_spill]]  ;;  %s3095_s18 = sld [smem:[#allocation18_spill]] }
 0x374   : > { %p3097_p3 = scmp.ge.s32.totalorder %s2597_s26, 2 }
 0x379   : > { %s1821_s16 = sand.u32 1, %s3094_s0   ;;  %p3096_p13 = scmp.ne.s32.totalorder %s3095_s18, 0 }
 0x37a   : > { %s1822_s2 = scalar_lea.sflag [#allocation4], %s1821_s16 }
 0x37b   : > { %p2295_p5 = pnand %p3097_p3, %p3096_p13 }
 0x37d   : > { %2572 = dma.done.wait (!%p2295_p5), %s1822_s2, 128  }
 0x37e   : > { %2574 = vsyncadd (!%p2295_p5), %s1822_s2, 4294967168  ;;  %s26_s26 = sadd.s32 1, %s2597_s26   ;;  %s3098_s21 = smov %s2581_s22 }
 0x37f   : > { %p23_p7 = scmp.ge.s32.totalorder %s26_s26, 4   ;;  %s3099_s22 = smov %s2585_s23 }
 0x380   : > { %s3100_s23 = smov %s2810_s19  ;;  %s3101_s24 = smov %s2593_s25 }
 0x381   : > { %s3102_s25 = smov %s3104_s10  ;;  %25 = sbr.rel (!%p23_p7) target bundleno = 16 (0x10), region = 114 }
 0x388   :  { %1827 = vsyncpa [#allocation3], 1 }
 0x389   :  { %1829 = vsyncpa [#allocation3 + $0x1], 1 }
 0x38a   :  { %1830 = vsyncpa [#allocation6], 1 }
 0x38b   :  { %1832 = vsyncpa [#allocation6 + $0x1], 1 }
 0x38c   :  { %1833 = vsyncpa [#allocation9], 1 }
 0x38d   :  { %1834 = vsyncpa [#allocation4], 1 }
 0x38e   :  { %1836 = vsyncpa [#allocation4 + $0x1], 1 }

</bundles_post_ra>
